<compile_context>
chip_gen: v5e
topology: v5e:2x2
jax: 0.10.0
libtpu: 0.0.40
codegen_flags: <defaults>
</compile_context>

<pallas_src>
import math

import jax
import jax.numpy as jnp
from jax.experimental import pallas as pl
from jax.experimental.pallas import tpu as pltpu

_LANES = 128


def _round_up(x, m):
    return -(-x // m) * m


# ----------------------------------------------------------------------------
# Fused kernel: the whole TCN for one (TB, L, Cpad) batch tile.
# ----------------------------------------------------------------------------
def _make_fused_tcn_kernel(dilations, has_down, K, L, halo, Cpad, TB):
    n_layers = len(dilations)
    rows = TB * L

    def kernel(*refs):
        x_ref = refs[0]
        layer_refs = [refs[1 + 4 * l: 5 + 4 * l] for l in range(n_layers)]
        o_ref = refs[1 + 4 * n_layers]
        act_ref, tmp_ref, stk_ref = refs[2 + 4 * n_layers: 5 + 4 * n_layers]

        # Zero the causal-halo rows once.  These rows ARE the zero padding of
        # the causal conv, so the shifted reads below need no concatenate/mask.
        if halo > 0:
            zpad = jnp.zeros((TB, halo, Cpad), jnp.float32)
            act_ref[:, pl.ds(0, halo), :] = zpad
            tmp_ref[:, pl.ds(0, halo), :] = zpad

        # Stage the (bf16) input tile into the f32 activation buffer.
        act_ref[:, pl.ds(halo, L), :] = x_ref[...].astype(jnp.float32)

        def load_stacked(src_ref, dil):
            """Pack the K dilated taps along lanes -> (rows, K*Cpad) bf16.

            Tap j multiplies the activation shifted by s = (K-1-j)*dil; the
            halo rows provide the causal zeros.  One matmul with a K*Cpad-deep
            contraction replaces K separate 128-deep matmuls.
            TODO(synk): the shifted reads at (halo - s) are sublane-unaligned;
                        an XLU roll + mask would avoid the relayout copy.
            """
            for j in range(K):
                s = (K - 1 - j) * dil
                y = src_ref[:, pl.ds(halo - s, L), :].astype(jnp.bfloat16)
                stk_ref[:, pl.ds(j * Cpad, Cpad)] = y.reshape(rows, Cpad)
            return stk_ref[...]

        for l in range(n_layers):
            w1_ref, b1_ref, w2_ref, b2_ref = layer_refs[l]
            dil = dilations[l]

            # conv1 (+ fused 1x1 downsample along N when present)
            y1 = load_stacked(act_ref, dil)                       # (rows, K*Cpad) bf16
            z1 = jnp.dot(y1, w1_ref[...],
                         preferred_element_type=jnp.float32) + b1_ref[...]
            if has_down[l]:
                h1 = jnp.maximum(z1[:, :Cpad], 0.0)
                res = z1[:, Cpad:]                                # x @ wd + bd
            else:
                h1 = jnp.maximum(z1, 0.0)
                res = act_ref[:, pl.ds(halo, L), :].reshape(rows, Cpad)

            # conv2
            tmp_ref[:, pl.ds(halo, L), :] = h1.reshape(TB, L, Cpad)
            y2 = load_stacked(tmp_ref, dil)
            h2 = jnp.maximum(
                jnp.dot(y2, w2_ref[...],
                        preferred_element_type=jnp.float32) + b2_ref[...], 0.0)

            # TODO(synk): dropout layers are identity in eval mode; no RNG.
            out = jnp.maximum(h2 + res, 0.0)

            if l == n_layers - 1:
                o_ref[...] = out.reshape(TB, L, Cpad).astype(o_ref.dtype)
            else:
                act_ref[:, pl.ds(halo, L), :] = out.reshape(TB, L, Cpad)

    return kernel


# ----------------------------------------------------------------------------
# Chip-aware tiling / VMEM policy
# ----------------------------------------------------------------------------
def _vmem_capacity_bytes():
    try:
        info = pltpu.get_tpu_info()
        cap = getattr(info, "vmem_capacity_bytes", None)
        if cap:
            return int(cap)
    except Exception:
        pass
    return 64 * 1024 * 1024          # conservative default (v7x per-core VMEM)


def _choose_batch_tile(B, L, Cpad, halo, K, weight_bytes, vmem_budget, two_core):
    """Pick TB so rows = TB*L keeps the MXU M dim fed, within the VMEM budget.
    On 2-TensorCore chips keep >= 2 grid steps only if that still leaves a
    reasonable M (>= 256 rows)."""
    if L % 8 != 0:
        return 1

    def need(tb):
        r = tb * L
        io = 2 * 2 * tb * L * Cpad * 2                 # in + out blocks, 2x buffered, bf16
        scr = 2 * tb * (halo + L) * Cpad * 4           # act/tmp scratch (f32)
        stk = r * K * Cpad * 2                         # stacked matmul operand (bf16)
        tmps = r * Cpad * 4 * 6 + r * 2 * Cpad * 4     # live f32 temporaries (z1,h1,res,h2,out)
        return io + scr + stk + tmps + 2 * weight_bytes

    tb = min(B, max(1, 2048 // L))                     # ~2048-row tiles
    if two_core and B >= 2 and (B // 2) * L >= 256:
        tb = min(tb, B // 2)
    while tb > 1 and need(tb) > vmem_budget:
        tb -= 1
    return max(tb, 1)


# ----------------------------------------------------------------------------
# Wrapper (NCL in, NCL out -- same API as the PyTorch module; output is bf16)
# ----------------------------------------------------------------------------
def temporal_conv_net(x_ncl, params, kernel_size):
    """x_ncl: (B, C_in, L) float32  ->  (B, C_out, L) bfloat16."""
    B, C_in, L = x_ncl.shape
    n_layers = len(params)
    K = kernel_size
    Cpad = params[0]["w2"].shape[-1]
    c_last = params[-1]["cout"]
    dilations = [2 ** i for i in range(n_layers)]
    has_down = [p["has_down"] for p in params]
    s_max = (K - 1) * dilations[-1]
    halo = _round_up(s_max, 8) if s_max > 0 else 0

    # Weight / bias operands (grid-invariant index_map -> fetched once, reused).
    w_args = []
    for p in params:
        w_args += [p["w1"], p["b1"], p["w2"], p["b2"]]
    weight_bytes = sum(int(a.size) * a.dtype.itemsize for a in w_args)

    vmem_cap = _vmem_capacity_bytes()
    two_core = vmem_cap <= 96 * 1024 * 1024            # v7x heuristic (64 MiB / 2 TCs)
    vmem_limit = max(32 * 1024 * 1024,
                     min(int(vmem_cap * 0.80), vmem_cap - 8 * 1024 * 1024))
    TB = _choose_batch_tile(B, L, Cpad, halo, K, weight_bytes,
                            int(vmem_limit * 0.9), two_core)
    B_pad = _round_up(B, TB)

    # NCL -> channels-last; pad channels to a dense multiple of 128 lanes and
    # batch to a multiple of the batch tile; bf16 at the HBM boundary.
    # TODO(synk): in the full STAGGCN these boundary transposes would be fused
    #             with neighbouring ops; here we keep the module's NCL API.
    x = jnp.transpose(x_ncl, (0, 2, 1)).astype(jnp.float32)
    x = jnp.pad(x, ((0, B_pad - B), (0, 0), (0, Cpad - C_in))).astype(jnp.bfloat16)

    def const_spec(a):
        # Grid-invariant block index: Pallas DMAs it once and reuses the buffer.
        return pl.BlockSpec(a.shape, lambda b, _nd=a.ndim: (0,) * _nd)

    in_specs = [pl.BlockSpec((TB, L, Cpad), lambda b: (b, 0, 0))]
    in_specs += [const_spec(a) for a in w_args]

    kernel = _make_fused_tcn_kernel(dilations, has_down, K, L, halo, Cpad, TB)

    out = pl.pallas_call(
        kernel,
        out_shape=jax.ShapeDtypeStruct((B_pad, L, Cpad), jnp.bfloat16),
        grid=(B_pad // TB,),
        in_specs=in_specs,
        out_specs=pl.BlockSpec((TB, L, Cpad), lambda b: (b, 0, 0)),
        scratch_shapes=[pltpu.VMEM((TB, halo + L, Cpad), jnp.float32),
                        pltpu.VMEM((TB, halo + L, Cpad), jnp.float32),
                        pltpu.VMEM((TB * L, K * Cpad), jnp.bfloat16)],
        compiler_params=pltpu.CompilerParams(
            dimension_semantics=("parallel",),
            vmem_limit_bytes=int(vmem_limit),
        ),
    )(x, *w_args)

    out = out[:B, :, :c_last]
    return jnp.transpose(out, (0, 2, 1))


# ----------------------------------------------------------------------------
# Parameter construction (mirrors weight_norm + init_weights; channel-padded,
# taps pre-stacked along the contraction axis, downsample fused along N)
# ----------------------------------------------------------------------------
def _weight_norm_effective(v, g):
    # v: (Cout, Cin, K), g: (Cout,) -> w = g * v / ||v||, norm over (Cin, K).
    norm = jnp.sqrt(jnp.sum(v * v, axis=(1, 2), keepdims=True))
    return v * (g[:, None, None] / norm)


def make_tcn_params(key, num_inputs, num_channels, kernel_size):
    widths = [num_inputs] + list(num_channels)
    Cpad = _round_up(max(widths), _LANES)
    K = kernel_size
    params = []
    for i, out_ch in enumerate(num_channels):
        in_ch = widths[i]
        key, k1, k2, k3, k4, k5, k6, k7 = jax.random.split(key, 8)
        v1 = 0.01 * jax.random.normal(k1, (out_ch, in_ch, K), jnp.float32)
        g1 = 1.0 + 0.05 * jax.random.normal(k2, (out_ch,), jnp.float32)
        v2 = 0.01 * jax.random.normal(k3, (out_ch, out_ch, K), jnp.float32)
        g2 = 1.0 + 0.05 * jax.random.normal(k4, (out_ch,), jnp.float32)
        # effective weight_norm weights, reordered to (K, Cin, Cout)
        w1 = jnp.transpose(_weight_norm_effective(v1, g1), (2, 1, 0))
        w2 = jnp.transpose(_weight_norm_effective(v2, g2), (2, 1, 0))
        bnd1 = 1.0 / math.sqrt(in_ch * K)
        bnd2 = 1.0 / math.sqrt(out_ch * K)
        b1 = jax.random.uniform(k5, (1, out_ch), jnp.float32, -bnd1, bnd1)
        b2 = jax.random.uniform(k6, (1, out_ch), jnp.float32, -bnd2, bnd2)

        # pad channels to Cpad and stack the K taps along the contraction axis
        w1s = jnp.pad(w1, ((0, 0), (0, Cpad - in_ch), (0, Cpad - out_ch))
                      ).reshape(K * Cpad, Cpad)
        w2s = jnp.pad(w2, ((0, 0), (0, Cpad - out_ch), (0, Cpad - out_ch))
                      ).reshape(K * Cpad, Cpad)
        b1p = jnp.pad(b1, ((0, 0), (0, Cpad - out_ch)))
        b2p = jnp.pad(b2, ((0, 0), (0, Cpad - out_ch)))

        has_down = in_ch != out_ch
        if has_down:
            kd, kb = jax.random.split(k7)
            wd = 0.01 * jax.random.normal(kd, (out_ch, in_ch, 1), jnp.float32)
            bndd = 1.0 / math.sqrt(in_ch)
            bd = jax.random.uniform(kb, (1, out_ch), jnp.float32, -bndd, bndd)
            wdp = jnp.pad(jnp.transpose(wd[:, :, 0], (1, 0)),
                          ((0, Cpad - in_ch), (0, Cpad - out_ch)))
            # 1x1 downsample consumes the same unshifted activation as conv1's
            # s=0 tap (row block K-1) -> fuse along the output-channel axis.
            wd_block = jnp.concatenate(
                [jnp.zeros(((K - 1) * Cpad, Cpad), jnp.float32), wdp], axis=0)
            w1s = jnp.concatenate([w1s, wd_block], axis=1)       # (K*Cpad, 2*Cpad)
            b1p = jnp.concatenate(
                [b1p, jnp.pad(bd, ((0, 0), (0, Cpad - out_ch)))], axis=1)

        params.append({
            "w1": w1s.astype(jnp.bfloat16),
            "b1": b1p,
            "w2": w2s.astype(jnp.bfloat16),
            "b2": b2p,
            "cout": out_ch,
            "has_down": has_down,
        })
    return params


# ----------------------------------------------------------------------------
# Plain-JAX reference with matching numerics (bf16 matmul operands and bf16
# HBM boundary, f32 accumulation / inter-layer carry) for the correctness check.
# ----------------------------------------------------------------------------
def temporal_conv_net_ref(x_ncl, params, kernel_size):
    B, C_in, L = x_ncl.shape
    Cpad = params[0]["w2"].shape[-1]
    K = kernel_size

    x = jnp.transpose(x_ncl, (0, 2, 1)).astype(jnp.float32)
    x = jnp.pad(x, ((0, 0), (0, 0), (0, Cpad - C_in)))
    x = x.astype(jnp.bfloat16).astype(jnp.float32)     # HBM-boundary cast

    def stacked(y, dil):                                # y: (B, L, Cpad) f32
        yb = y.astype(jnp.bfloat16)
        parts = []
        for j in range(K):
            s = (K - 1 - j) * dil
            ys = yb if s == 0 else jnp.concatenate(
                [jnp.zeros((B, s, Cpad), yb.dtype), yb[:, :L - s, :]], axis=1)
            parts.append(ys)
        return jnp.concatenate(parts, axis=-1)          # (B, L, K*Cpad) bf16

    for i, p in enumerate(params):
        dil = 2 ** i
        z1 = jnp.einsum("blc,cd->bld", stacked(x, dil), p["w1"],
                        preferred_element_type=jnp.float32) + p["b1"][None]
        if p["has_down"]:
            h1 = jnp.maximum(z1[..., :Cpad], 0.0)
            res = z1[..., Cpad:]
        else:
            h1 = jnp.maximum(z1, 0.0)
            res = x
        z2 = jnp.einsum("blc,cd->bld", stacked(h1, dil), p["w2"],
                        preferred_element_type=jnp.float32) + p["b2"][None]
        h2 = jnp.maximum(z2, 0.0)
        x = jnp.maximum(h2 + res, 0.0)

    out = x[:, :, :params[-1]["cout"]].astype(jnp.bfloat16)
    return jnp.transpose(out, (0, 2, 1))


# ----------------------------------------------------------------------------
if __name__ == "__main__":
    key = jax.random.PRNGKey(0)
    kp, kx = jax.random.split(key)

    # Small shapes consistent with the module: x is (batch, num_inputs, seq_len)
    B, num_inputs, L = 2, 4, 16
    num_channels = [8, 8]          # two TemporalBlocks, dilations 1 and 2
    kernel_size = 2

    params = make_tcn_params(kp, num_inputs, num_channels, kernel_size)
    x = jax.random.normal(kx, (B, num_inputs, L), jnp.float32)

    out = jax.block_until_ready(temporal_conv_net(x, params, kernel_size))
    ref = jax.block_until_ready(temporal_conv_net_ref(x, params, kernel_size))

    assert out.shape == (B, num_channels[-1], L)
    out_f = out.astype(jnp.float32)
    ref_f = ref.astype(jnp.float32)
    err = float(jnp.max(jnp.abs(out_f - ref_f)))
    assert jnp.allclose(out_f, ref_f, atol=1e-2, rtol=1e-2), f"mismatch vs reference (max err {err})"

    print("KERNEL_OK")
</pallas_src>

<mosaic_0001>
module attributes {stable_mosaic.version = 11 : i64} {
  func.func @kernel(%arg0: i32, %arg1: memref<2x16x128xbf16, #tpu.memory_space<vmem>>, %arg2: memref<256x256xbf16, #tpu.memory_space<vmem>>, %arg3: memref<1x256xf32, #tpu.memory_space<vmem>>, %arg4: memref<256x128xbf16, #tpu.memory_space<vmem>>, %arg5: memref<1x128xf32, #tpu.memory_space<vmem>>, %arg6: memref<256x128xbf16, #tpu.memory_space<vmem>>, %arg7: memref<1x128xf32, #tpu.memory_space<vmem>>, %arg8: memref<256x128xbf16, #tpu.memory_space<vmem>>, %arg9: memref<1x128xf32, #tpu.memory_space<vmem>>, %arg10: memref<2x16x128xbf16, #tpu.memory_space<vmem>>, %arg11: memref<2x24x128xf32, #tpu.memory_space<vmem>>, %arg12: memref<2x24x128xf32, #tpu.memory_space<vmem>>, %arg13: memref<32x256xbf16, #tpu.memory_space<vmem>>) attributes {dimension_semantics = [#tpu.dimension_semantics<parallel>], iteration_bounds = array<i64: 1>, scalar_prefetch = 0 : i64, scratch_operands = 3 : i64, tpu.core_type = #tpu.core_type<tc>, window_params = [{transform_indices = @transform_0, window_bounds = array<i64: 2, 16, 128>}, {pipeline_mode = #tpu.pipeline_mode<synchronous>, transform_indices = @transform_1, window_bounds = array<i64: 256, 256>}, {pipeline_mode = #tpu.pipeline_mode<synchronous>, transform_indices = @transform_2, window_bounds = array<i64: 1, 256>}, {pipeline_mode = #tpu.pipeline_mode<synchronous>, transform_indices = @transform_3, window_bounds = array<i64: 256, 128>}, {pipeline_mode = #tpu.pipeline_mode<synchronous>, transform_indices = @transform_4, window_bounds = array<i64: 1, 128>}, {pipeline_mode = #tpu.pipeline_mode<synchronous>, transform_indices = @transform_5, window_bounds = array<i64: 256, 128>}, {pipeline_mode = #tpu.pipeline_mode<synchronous>, transform_indices = @transform_6, window_bounds = array<i64: 1, 128>}, {pipeline_mode = #tpu.pipeline_mode<synchronous>, transform_indices = @transform_7, window_bounds = array<i64: 256, 128>}, {pipeline_mode = #tpu.pipeline_mode<synchronous>, transform_indices = @transform_8, window_bounds = array<i64: 1, 128>}, {transform_indices = @transform_9, window_bounds = array<i64: 2, 16, 128>}]} {
    %cst = arith.constant 0.000000e+00 : f32
    %0 = vector.broadcast %cst : f32 to vector<2x8x128xf32>
    %c0 = arith.constant 0 : index
    %c0_0 = arith.constant 0 : index
    %c0_1 = arith.constant 0 : index
    %1 = vector.load %arg11[%c0, %c0_0, %c0_1] : memref<2x24x128xf32, #tpu.memory_space<vmem>>, vector<2x8x128xf32>
    tpu.vector_store %arg11[%c0, %c0_0, %c0_1], %0 {strides = array<i32>} : memref<2x24x128xf32, #tpu.memory_space<vmem>>, vector<2x8x128xf32>,
    %c0_2 = arith.constant 0 : index
    %c0_3 = arith.constant 0 : index
    %c0_4 = arith.constant 0 : index
    %2 = vector.load %arg12[%c0_2, %c0_3, %c0_4] : memref<2x24x128xf32, #tpu.memory_space<vmem>>, vector<2x8x128xf32>
    tpu.vector_store %arg12[%c0_2, %c0_3, %c0_4], %0 {strides = array<i32>} : memref<2x24x128xf32, #tpu.memory_space<vmem>>, vector<2x8x128xf32>,
    %c0_5 = arith.constant 0 : index
    %c0_6 = arith.constant 0 : index
    %c0_7 = arith.constant 0 : index
    %3 = vector.load %arg1[%c0_5, %c0_6, %c0_7] : memref<2x16x128xbf16, #tpu.memory_space<vmem>>, vector<2x16x128xbf16>
    %4 = arith.extf %3 : vector<2x16x128xbf16> to vector<2x16x128xf32>
    %c0_8 = arith.constant 0 : index
    %c8 = arith.constant 8 : index
    %c0_9 = arith.constant 0 : index
    %5 = vector.load %arg11[%c0_8, %c8, %c0_9] : memref<2x24x128xf32, #tpu.memory_space<vmem>>, vector<2x16x128xf32>
    tpu.vector_store %arg11[%c0_8, %c8, %c0_9], %4 {strides = array<i32>} : memref<2x24x128xf32, #tpu.memory_space<vmem>>, vector<2x16x128xf32>,
    %c0_10 = arith.constant 0 : index
    %c7 = arith.constant 7 : index
    %c0_11 = arith.constant 0 : index
    %6 = vector.load %arg11[%c0_10, %c7, %c0_11] : memref<2x24x128xf32, #tpu.memory_space<vmem>>, vector<2x16x128xf32>
    %7 = arith.truncf %6 : vector<2x16x128xf32> to vector<2x16x128xbf16>
    %8 = vector.shape_cast %7 : vector<2x16x128xbf16> to vector<32x128xbf16>
    %c0_12 = arith.constant 0 : index
    %c0_13 = arith.constant 0 : index
    %9 = vector.load %arg13[%c0_12, %c0_13] : memref<32x256xbf16, #tpu.memory_space<vmem>>, vector<32x128xbf16>
    tpu.vector_store %arg13[%c0_12, %c0_13], %8 {strides = array<i32>} : memref<32x256xbf16, #tpu.memory_space<vmem>>, vector<32x128xbf16>,
    %c0_14 = arith.constant 0 : index
    %c8_15 = arith.constant 8 : index
    %c0_16 = arith.constant 0 : index
    %10 = vector.load %arg11[%c0_14, %c8_15, %c0_16] : memref<2x24x128xf32, #tpu.memory_space<vmem>>, vector<2x16x128xf32>
    %11 = arith.truncf %10 : vector<2x16x128xf32> to vector<2x16x128xbf16>
    %12 = vector.shape_cast %11 : vector<2x16x128xbf16> to vector<32x128xbf16>
    %c0_17 = arith.constant 0 : index
    %c128 = arith.constant 128 : index
    %13 = vector.load %arg13[%c0_17, %c128] : memref<32x256xbf16, #tpu.memory_space<vmem>>, vector<32x128xbf16>
    tpu.vector_store %arg13[%c0_17, %c128], %12 {strides = array<i32>} : memref<32x256xbf16, #tpu.memory_space<vmem>>, vector<32x128xbf16>,
    %c0_18 = arith.constant 0 : index
    %c0_19 = arith.constant 0 : index
    %14 = vector.load %arg13[%c0_18, %c0_19] : memref<32x256xbf16, #tpu.memory_space<vmem>>, vector<32x256xbf16>
    %c0_20 = arith.constant 0 : index
    %c0_21 = arith.constant 0 : index
    %15 = vector.load %arg2[%c0_20, %c0_21] : memref<256x256xbf16, #tpu.memory_space<vmem>>, vector<256x256xbf16>
    %cst_22 = arith.constant dense<0.000000e+00> : vector<32x256xf32>
    %16 = tpu.matmul %14, %15, %cst_22 {dimension_numbers = #tpu.dot_dimension_numbers<[1], [0], [0], [1], [0, 0, 1, 1], [], []>} : vector<32x256xbf16>, vector<256x256xbf16>, vector<32x256xf32> -> vector<32x256xf32>
    %c0_23 = arith.constant 0 : index
    %c0_24 = arith.constant 0 : index
    %17 = vector.load %arg3[%c0_23, %c0_24] : memref<1x256xf32, #tpu.memory_space<vmem>>, vector<1x256xf32>
    %18 = vector.broadcast %17 : vector<1x256xf32> to vector<32x256xf32>
    %19 = arith.addf %16, %18 : vector<32x256xf32>
    %20 = vector.extract_strided_slice %19 {offsets = [0, 0], sizes = [32, 128], strides = [1, 1]} : vector<32x256xf32> to vector<32x128xf32>
    %cst_25 = arith.constant 0.000000e+00 : f32
    %21 = vector.broadcast %cst_25 : f32 to vector<32x128xf32>
    %22 = arith.maximumf %20, %21 : vector<32x128xf32>
    %23 = vector.extract_strided_slice %19 {offsets = [0, 128], sizes = [32, 128], strides = [1, 1]} : vector<32x256xf32> to vector<32x128xf32>
    %24 = vector.shape_cast %22 : vector<32x128xf32> to vector<2x16x128xf32>
    %c0_26 = arith.constant 0 : index
    %c8_27 = arith.constant 8 : index
    %c0_28 = arith.constant 0 : index
    %25 = vector.load %arg12[%c0_26, %c8_27, %c0_28] : memref<2x24x128xf32, #tpu.memory_space<vmem>>, vector<2x16x128xf32>
    tpu.vector_store %arg12[%c0_26, %c8_27, %c0_28], %24 {strides = array<i32>} : memref<2x24x128xf32, #tpu.memory_space<vmem>>, vector<2x16x128xf32>,
    %c0_29 = arith.constant 0 : index
    %c7_30 = arith.constant 7 : index
    %c0_31 = arith.constant 0 : index
    %26 = vector.load %arg12[%c0_29, %c7_30, %c0_31] : memref<2x24x128xf32, #tpu.memory_space<vmem>>, vector<2x16x128xf32>
    %27 = arith.truncf %26 : vector<2x16x128xf32> to vector<2x16x128xbf16>
    %28 = vector.shape_cast %27 : vector<2x16x128xbf16> to vector<32x128xbf16>
    %c0_32 = arith.constant 0 : index
    %c0_33 = arith.constant 0 : index
    %29 = vector.load %arg13[%c0_32, %c0_33] : memref<32x256xbf16, #tpu.memory_space<vmem>>, vector<32x128xbf16>
    tpu.vector_store %arg13[%c0_32, %c0_33], %28 {strides = array<i32>} : memref<32x256xbf16, #tpu.memory_space<vmem>>, vector<32x128xbf16>,
    %c0_34 = arith.constant 0 : index
    %c8_35 = arith.constant 8 : index
    %c0_36 = arith.constant 0 : index
    %30 = vector.load %arg12[%c0_34, %c8_35, %c0_36] : memref<2x24x128xf32, #tpu.memory_space<vmem>>, vector<2x16x128xf32>
    %31 = arith.truncf %30 : vector<2x16x128xf32> to vector<2x16x128xbf16>
    %32 = vector.shape_cast %31 : vector<2x16x128xbf16> to vector<32x128xbf16>
    %c0_37 = arith.constant 0 : index
    %c128_38 = arith.constant 128 : index
    %33 = vector.load %arg13[%c0_37, %c128_38] : memref<32x256xbf16, #tpu.memory_space<vmem>>, vector<32x128xbf16>
    tpu.vector_store %arg13[%c0_37, %c128_38], %32 {strides = array<i32>} : memref<32x256xbf16, #tpu.memory_space<vmem>>, vector<32x128xbf16>,
    %c0_39 = arith.constant 0 : index
    %c0_40 = arith.constant 0 : index
    %34 = vector.load %arg13[%c0_39, %c0_40] : memref<32x256xbf16, #tpu.memory_space<vmem>>, vector<32x256xbf16>
    %c0_41 = arith.constant 0 : index
    %c0_42 = arith.constant 0 : index
    %35 = vector.load %arg4[%c0_41, %c0_42] : memref<256x128xbf16, #tpu.memory_space<vmem>>, vector<256x128xbf16>
    %cst_43 = arith.constant dense<0.000000e+00> : vector<32x128xf32>
    %36 = tpu.matmul %34, %35, %cst_43 {dimension_numbers = #tpu.dot_dimension_numbers<[1], [0], [0], [1], [0, 0, 1, 1], [], []>} : vector<32x256xbf16>, vector<256x128xbf16>, vector<32x128xf32> -> vector<32x128xf32>
    %c0_44 = arith.constant 0 : index
    %c0_45 = arith.constant 0 : index
    %37 = vector.load %arg5[%c0_44, %c0_45] : memref<1x128xf32, #tpu.memory_space<vmem>>, vector<1x128xf32>
    %38 = vector.broadcast %37 : vector<1x128xf32> to vector<32x128xf32>
    %39 = arith.addf %36, %38 : vector<32x128xf32>
    %cst_46 = arith.constant 0.000000e+00 : f32
    %40 = vector.broadcast %cst_46 : f32 to vector<32x128xf32>
    %41 = arith.maximumf %39, %40 : vector<32x128xf32>
    %42 = arith.addf %41, %23 : vector<32x128xf32>
    %cst_47 = arith.constant 0.000000e+00 : f32
    %43 = vector.broadcast %cst_47 : f32 to vector<32x128xf32>
    %44 = arith.maximumf %42, %43 : vector<32x128xf32>
    %45 = vector.shape_cast %44 : vector<32x128xf32> to vector<2x16x128xf32>
    %c0_48 = arith.constant 0 : index
    %c8_49 = arith.constant 8 : index
    %c0_50 = arith.constant 0 : index
    %46 = vector.load %arg11[%c0_48, %c8_49, %c0_50] : memref<2x24x128xf32, #tpu.memory_space<vmem>>, vector<2x16x128xf32>
    tpu.vector_store %arg11[%c0_48, %c8_49, %c0_50], %45 {strides = array<i32>} : memref<2x24x128xf32, #tpu.memory_space<vmem>>, vector<2x16x128xf32>,
    %c0_51 = arith.constant 0 : index
    %c6 = arith.constant 6 : index
    %c0_52 = arith.constant 0 : index
    %47 = vector.load %arg11[%c0_51, %c6, %c0_52] : memref<2x24x128xf32, #tpu.memory_space<vmem>>, vector<2x16x128xf32>
    %48 = arith.truncf %47 : vector<2x16x128xf32> to vector<2x16x128xbf16>
    %49 = vector.shape_cast %48 : vector<2x16x128xbf16> to vector<32x128xbf16>
    %c0_53 = arith.constant 0 : index
    %c0_54 = arith.constant 0 : index
    %50 = vector.load %arg13[%c0_53, %c0_54] : memref<32x256xbf16, #tpu.memory_space<vmem>>, vector<32x128xbf16>
    tpu.vector_store %arg13[%c0_53, %c0_54], %49 {strides = array<i32>} : memref<32x256xbf16, #tpu.memory_space<vmem>>, vector<32x128xbf16>,
    %c0_55 = arith.constant 0 : index
    %c8_56 = arith.constant 8 : index
    %c0_57 = arith.constant 0 : index
    %51 = vector.load %arg11[%c0_55, %c8_56, %c0_57] : memref<2x24x128xf32, #tpu.memory_space<vmem>>, vector<2x16x128xf32>
    %52 = arith.truncf %51 : vector<2x16x128xf32> to vector<2x16x128xbf16>
    %53 = vector.shape_cast %52 : vector<2x16x128xbf16> to vector<32x128xbf16>
    %c0_58 = arith.constant 0 : index
    %c128_59 = arith.constant 128 : index
    %54 = vector.load %arg13[%c0_58, %c128_59] : memref<32x256xbf16, #tpu.memory_space<vmem>>, vector<32x128xbf16>
    tpu.vector_store %arg13[%c0_58, %c128_59], %53 {strides = array<i32>} : memref<32x256xbf16, #tpu.memory_space<vmem>>, vector<32x128xbf16>,
    %c0_60 = arith.constant 0 : index
    %c0_61 = arith.constant 0 : index
    %55 = vector.load %arg13[%c0_60, %c0_61] : memref<32x256xbf16, #tpu.memory_space<vmem>>, vector<32x256xbf16>
    %c0_62 = arith.constant 0 : index
    %c0_63 = arith.constant 0 : index
    %56 = vector.load %arg6[%c0_62, %c0_63] : memref<256x128xbf16, #tpu.memory_space<vmem>>, vector<256x128xbf16>
    %cst_64 = arith.constant dense<0.000000e+00> : vector<32x128xf32>
    %57 = tpu.matmul %55, %56, %cst_64 {dimension_numbers = #tpu.dot_dimension_numbers<[1], [0], [0], [1], [0, 0, 1, 1], [], []>} : vector<32x256xbf16>, vector<256x128xbf16>, vector<32x128xf32> -> vector<32x128xf32>
    %c0_65 = arith.constant 0 : index
    %c0_66 = arith.constant 0 : index
    %58 = vector.load %arg7[%c0_65, %c0_66] : memref<1x128xf32, #tpu.memory_space<vmem>>, vector<1x128xf32>
    %59 = vector.broadcast %58 : vector<1x128xf32> to vector<32x128xf32>
    %60 = arith.addf %57, %59 : vector<32x128xf32>
    %cst_67 = arith.constant 0.000000e+00 : f32
    %61 = vector.broadcast %cst_67 : f32 to vector<32x128xf32>
    %62 = arith.maximumf %60, %61 : vector<32x128xf32>
    %c0_68 = arith.constant 0 : index
    %c8_69 = arith.constant 8 : index
    %c0_70 = arith.constant 0 : index
    %63 = vector.load %arg11[%c0_68, %c8_69, %c0_70] : memref<2x24x128xf32, #tpu.memory_space<vmem>>, vector<2x16x128xf32>
    %64 = vector.shape_cast %63 : vector<2x16x128xf32> to vector<32x128xf32>
    %65 = vector.shape_cast %62 : vector<32x128xf32> to vector<2x16x128xf32>
    %c0_71 = arith.constant 0 : index
    %c8_72 = arith.constant 8 : index
    %c0_73 = arith.constant 0 : index
    %66 = vector.load %arg12[%c0_71, %c8_72, %c0_73] : memref<2x24x128xf32, #tpu.memory_space<vmem>>, vector<2x16x128xf32>
    tpu.vector_store %arg12[%c0_71, %c8_72, %c0_73], %65 {strides = array<i32>} : memref<2x24x128xf32, #tpu.memory_space<vmem>>, vector<2x16x128xf32>,
    %c0_74 = arith.constant 0 : index
    %c6_75 = arith.constant 6 : index
    %c0_76 = arith.constant 0 : index
    %67 = vector.load %arg12[%c0_74, %c6_75, %c0_76] : memref<2x24x128xf32, #tpu.memory_space<vmem>>, vector<2x16x128xf32>
    %68 = arith.truncf %67 : vector<2x16x128xf32> to vector<2x16x128xbf16>
    %69 = vector.shape_cast %68 : vector<2x16x128xbf16> to vector<32x128xbf16>
    %c0_77 = arith.constant 0 : index
    %c0_78 = arith.constant 0 : index
    %70 = vector.load %arg13[%c0_77, %c0_78] : memref<32x256xbf16, #tpu.memory_space<vmem>>, vector<32x128xbf16>
    tpu.vector_store %arg13[%c0_77, %c0_78], %69 {strides = array<i32>} : memref<32x256xbf16, #tpu.memory_space<vmem>>, vector<32x128xbf16>,
    %c0_79 = arith.constant 0 : index
    %c8_80 = arith.constant 8 : index
    %c0_81 = arith.constant 0 : index
    %71 = vector.load %arg12[%c0_79, %c8_80, %c0_81] : memref<2x24x128xf32, #tpu.memory_space<vmem>>, vector<2x16x128xf32>
    %72 = arith.truncf %71 : vector<2x16x128xf32> to vector<2x16x128xbf16>
    %73 = vector.shape_cast %72 : vector<2x16x128xbf16> to vector<32x128xbf16>
    %c0_82 = arith.constant 0 : index
    %c128_83 = arith.constant 128 : index
    %74 = vector.load %arg13[%c0_82, %c128_83] : memref<32x256xbf16, #tpu.memory_space<vmem>>, vector<32x128xbf16>
    tpu.vector_store %arg13[%c0_82, %c128_83], %73 {strides = array<i32>} : memref<32x256xbf16, #tpu.memory_space<vmem>>, vector<32x128xbf16>,
    %c0_84 = arith.constant 0 : index
    %c0_85 = arith.constant 0 : index
    %75 = vector.load %arg13[%c0_84, %c0_85] : memref<32x256xbf16, #tpu.memory_space<vmem>>, vector<32x256xbf16>
    %c0_86 = arith.constant 0 : index
    %c0_87 = arith.constant 0 : index
    %76 = vector.load %arg8[%c0_86, %c0_87] : memref<256x128xbf16, #tpu.memory_space<vmem>>, vector<256x128xbf16>
    %cst_88 = arith.constant dense<0.000000e+00> : vector<32x128xf32>
    %77 = tpu.matmul %75, %76, %cst_88 {dimension_numbers = #tpu.dot_dimension_numbers<[1], [0], [0], [1], [0, 0, 1, 1], [], []>} : vector<32x256xbf16>, vector<256x128xbf16>, vector<32x128xf32> -> vector<32x128xf32>
    %c0_89 = arith.constant 0 : index
    %c0_90 = arith.constant 0 : index
    %78 = vector.load %arg9[%c0_89, %c0_90] : memref<1x128xf32, #tpu.memory_space<vmem>>, vector<1x128xf32>
    %79 = vector.broadcast %78 : vector<1x128xf32> to vector<32x128xf32>
    %80 = arith.addf %77, %79 : vector<32x128xf32>
    %cst_91 = arith.constant 0.000000e+00 : f32
    %81 = vector.broadcast %cst_91 : f32 to vector<32x128xf32>
    %82 = arith.maximumf %80, %81 : vector<32x128xf32>
    %83 = arith.addf %82, %64 : vector<32x128xf32>
    %cst_92 = arith.constant 0.000000e+00 : f32
    %84 = vector.broadcast %cst_92 : f32 to vector<32x128xf32>
    %85 = arith.maximumf %83, %84 : vector<32x128xf32>
    %86 = vector.shape_cast %85 : vector<32x128xf32> to vector<2x16x128xf32>
    %87 = arith.truncf %86 : vector<2x16x128xf32> to vector<2x16x128xbf16>
    %c0_93 = arith.constant 0 : index
    %c0_94 = arith.constant 0 : index
    %c0_95 = arith.constant 0 : index
    %88 = vector.load %arg10[%c0_93, %c0_94, %c0_95] : memref<2x16x128xbf16, #tpu.memory_space<vmem>>, vector<2x16x128xbf16>
    tpu.vector_store %arg10[%c0_93, %c0_94, %c0_95], %87 {strides = array<i32>} : memref<2x16x128xbf16, #tpu.memory_space<vmem>>, vector<2x16x128xbf16>,
    return
  }
  func.func @transform_0(%arg0: i32) -> (i32, i32, i32) {
    %c0_i32 = arith.constant 0 : i32
    %c0_i32_0 = arith.constant 0 : i32
    %c0_i32_1 = arith.constant 0 : i32
    return %arg0, %c0_i32, %c0_i32_0 : i32, i32, i32
  }
  func.func @transform_1(%arg0: i32) -> (i32, i32) {
    %c0_i32 = arith.constant 0 : i32
    %c0_i32_0 = arith.constant 0 : i32
    %c0_i32_1 = arith.constant 0 : i32
    return %c0_i32, %c0_i32_0 : i32, i32
  }
  func.func @transform_2(%arg0: i32) -> (i32, i32) {
    %c0_i32 = arith.constant 0 : i32
    %c0_i32_0 = arith.constant 0 : i32
    %c0_i32_1 = arith.constant 0 : i32
    return %c0_i32, %c0_i32_0 : i32, i32
  }
  func.func @transform_3(%arg0: i32) -> (i32, i32) {
    %c0_i32 = arith.constant 0 : i32
    %c0_i32_0 = arith.constant 0 : i32
    %c0_i32_1 = arith.constant 0 : i32
    return %c0_i32, %c0_i32_0 : i32, i32
  }
  func.func @transform_4(%arg0: i32) -> (i32, i32) {
    %c0_i32 = arith.constant 0 : i32
    %c0_i32_0 = arith.constant 0 : i32
    %c0_i32_1 = arith.constant 0 : i32
    return %c0_i32, %c0_i32_0 : i32, i32
  }
  func.func @transform_5(%arg0: i32) -> (i32, i32) {
    %c0_i32 = arith.constant 0 : i32
    %c0_i32_0 = arith.constant 0 : i32
    %c0_i32_1 = arith.constant 0 : i32
    return %c0_i32, %c0_i32_0 : i32, i32
  }
  func.func @transform_6(%arg0: i32) -> (i32, i32) {
    %c0_i32 = arith.constant 0 : i32
    %c0_i32_0 = arith.constant 0 : i32
    %c0_i32_1 = arith.constant 0 : i32
    return %c0_i32, %c0_i32_0 : i32, i32
  }
  func.func @transform_7(%arg0: i32) -> (i32, i32) {
    %c0_i32 = arith.constant 0 : i32
    %c0_i32_0 = arith.constant 0 : i32
    %c0_i32_1 = arith.constant 0 : i32
    return %c0_i32, %c0_i32_0 : i32, i32
  }
  func.func @transform_8(%arg0: i32) -> (i32, i32) {
    %c0_i32 = arith.constant 0 : i32
    %c0_i32_0 = arith.constant 0 : i32
    %c0_i32_1 = arith.constant 0 : i32
    return %c0_i32, %c0_i32_0 : i32, i32
  }
  func.func @transform_9(%arg0: i32) -> (i32, i32, i32) {
    %c0_i32 = arith.constant 0 : i32
    %c0_i32_0 = arith.constant 0 : i32
    %c0_i32_1 = arith.constant 0 : i32
    return %arg0, %c0_i32, %c0_i32_0 : i32, i32, i32
  }
}

</mosaic_0001>

<bundles_post_ra>
// kernel: tpu_custom_call.1
= control target key start
LH: loop header
LB: loop body
LE: loop exit
PB: predicated region body
PF: predicated region fallthrough
CT: control target
= control target key end

     0   :  { %14 = vsyncpa [#allocation6], 0  ;;  %s2055_s0 = inlined_call_operand.hbm [shape: bf16[2,16,128], index: 0, kind: input, shape index: {}]   ;;  %s2056_s1 = inlined_call_operand.hbm [shape: bf16[256,256], index: 1, kind: input, shape index: {}]   ;;  %s2057_s2 = inlined_call_operand.hbm [shape: f32[1,256], index: 2, kind: input, shape index: {}]   ;;  %s2058_s3 = inlined_call_operand.hbm [shape: bf16[256,128], index: 3, kind: input, shape index: {}]   ;;  %s2059_s4 = inlined_call_operand.vmem [shape: f32[1,128], index: 4, kind: input, shape index: {}]   ;;  %s2060_s5 = inlined_call_operand.hbm [shape: bf16[256,128], index: 5, kind: input, shape index: {}]   ;;  %s2061_s6 = inlined_call_operand.vmem [shape: f32[1,128], index: 6, kind: input, shape index: {}]   ;;  %s2062_s7 = inlined_call_operand.hbm [shape: bf16[256,128], index: 7, kind: input, shape index: {}]   ;;  %s2063_s8 = inlined_call_operand.vmem [shape: f32[1,128], index: 8, kind: input, shape index: {}]   ;;  %s2064_s9 = inlined_call_operand.hbm [shape: bf16[2,16,128], index: 9, kind: output, shape index: {}]  }
   0x1   :  { %15 = vsyncpa [#allocation9], 0 }
   0x2   :  { %16 = vsyncpa [#allocation12], 0 }
   0x3   :  { %17 = vsyncpa [#allocation15], 0  ;;  %s36_s11 = sshll.u32 %s2056_s1, 4  ;;  %s37_s11 = int_to_ptr.hbm [resolvable:$true] %s36_s11 }
   0x4   :  { %18 = vsyncpa [#allocation7], 0  ;;  %s1904_s12 = smov [#allocation8]   ;;  %s1905_s14 = smov 128  }
   0x5   :  { %s38_s13 = sshll.u32 %s1904_s12, 4  ;;  %s1906_s15 = smov 8   ;;  %s39_s13 = int_to_ptr.vmem [resolvable:$true] %s38_s13 }
   0x6   :  { %44 = dma.hbm_to_vmem [thread:$0]  %s37_s11, 4096, %s39_s13, [#allocation9], %s1905_s14, %s1905_s14, %s1906_s15  }
   0x7   :  { %s60_s18 = sshll.u32 %s2058_s3, 4  ;;  %s1907_s19 = smov [#allocation11]   ;;  %s61_s18 = int_to_ptr.hbm [resolvable:$true] %s60_s18 }
   0x8   :  { %s62_s20 = sshll.u32 %s1907_s19, 4  ;;  %s23_s23 = sshll.u32 %s2055_s0, 4  ;;  %s63_s20 = int_to_ptr.vmem [resolvable:$true] %s62_s20  ;;  %s24_s23 = int_to_ptr.hbm [resolvable:$true] %s23_s23 }
   0x9   :  { %s1908_s1 = smov 64   ;;  %s1909_s24 = smov 4  }
   0xa   :  { %68 = dma.hbm_to_vmem [thread:$0]  %s61_s18, 2048, %s63_s20, [#allocation12], %s1908_s1, %s1908_s1, %s1909_s24  }
   0xb   :  { %s50_s27 = sshll.u32 %s2057_s2, 4  ;;  %s1910_s3 = smov [#allocation5]   ;;  %s51_s27 = int_to_ptr.hbm [resolvable:$true] %s50_s27 }
   0xc   :  { %s25_s28 = sshll.u32 %s1910_s3, 4  ;;  %s1911_s0 = smov [#allocation10]   ;;  %s26_s28 = int_to_ptr.vmem [resolvable:$true] %s25_s28 }
   0xd   :  { %31 = dma.hbm_to_vmem [thread:$0]  %s24_s23, 256, %s26_s28, [#allocation6], %s1908_s1, %s1908_s1, %s1909_s24  }
   0xe   :  { %s52_s29 = sshll.u32 %s1911_s0, 4  ;;  %s75_s11 = sshll.u32 %s2060_s5, 4  ;;  %s53_s29 = int_to_ptr.vmem [resolvable:$true] %s52_s29  ;;  %s76_s11 = int_to_ptr.hbm [resolvable:$true] %s75_s11 }
   0xf   :  { %55 = dma.hbm_to_vmem [thread:$0]  %s51_s27, 32, %s53_s29, [#allocation9]  }
  0x10   :  { %s90_s2 = sshll.u32 %s2062_s7, 4  ;;  %s1912_s14 = smov [#allocation13]   ;;  %s91_s2 = int_to_ptr.hbm [resolvable:$true] %s90_s2 }
  0x11   :  { %s77_s15 = sshll.u32 %s1912_s14, 4  ;;  %s1913_s16 = smov [#allocation14]   ;;  %s78_s15 = int_to_ptr.vmem [resolvable:$true] %s77_s15 }
  0x12   :  { %83 = dma.hbm_to_vmem [thread:$0]  %s76_s11, 2048, %s78_s15, [#allocation12], %s1908_s1, %s1908_s1, %s1909_s24  }
  0x13   :  { %s92_s17 = sshll.u32 %s1913_s16, 4  ;;  %s93_s17 = int_to_ptr.vmem [resolvable:$true] %s92_s17 }
  0x14   :  { %98 = dma.hbm_to_vmem [thread:$0]  %s91_s2, 2048, %s93_s17, [#allocation15], %s1908_s1, %s1908_s1, %s1909_s24  }
  0x15   :  { %1894 = dma.done.wait [#allocation6], 256  }
  0x16   :  { %1895 = vsyncadd [#allocation6], 4294967040 }
  0x17   :  { %1896 = dma.done.wait [#allocation9], 4128  }
  0x18   :  { %1897 = vsyncadd [#allocation9], 4294963168 }
  0x19   :  { %1898 = dma.done.wait [#allocation12], 4096  }
  0x1a   :  { %1899 = vsyncadd [#allocation12], 4294963200 }
  0x1b   :  { %1900 = dma.done.wait [#allocation15], 2048  }
  0x1c   :  { %1901 = vsyncadd [#allocation15], 4294965248  ;;  %v1914_v0 = vmov 0.0   ;;  %v1269_v1 = vld [vmem:[#allocation8 + $0x70] sm:$0xf]  ;;  %v1693_v27 = vld [vmem:[#allocation5 + $0x8] sm:$0xff]  }
  0x1d   :  { %125 = vst [vmem:[#allocation2] sm:$0xff] %v1914_v0  ;;  %v1598_v2 = vld [vmem:[#allocation8 + $0x74] sm:$0xf0]  ;;  %v1333_v3 = vld [vmem:[#allocation8 + $0xf0] sm:$0xf]  ;;  %v1681_v35 = vunpack.c.l.bf16 %v1693_v27  ;;  %v1682_v36 = vunpack.c.h.bf16 %v1693_v27  ;;  %s1179_s23 = sshll.u32 %s2064_s9, 4  ;;  %s1180_s23 = int_to_ptr.hbm [resolvable:$true] %s1179_s23 }
  0x1e   :  { %126 = vst [vmem:[#allocation2 + $0x18] sm:$0xff] %v1914_v0  ;;  %v1270_v4 = vor.u32 %v1598_v2, %v1269_v1  ;;  %v1614_v5 = vld [vmem:[#allocation8 + $0xf4] sm:$0xf0]  ;;  %v1261_v6 = vld [vmem:[#allocation8 + $0x60] sm:$0xf]  ;;  %v1676_v23 = vld [vmem:[#allocation5] sm:$0xff]  }
  0x1f   :  { %127 = vst [vmem:[#allocation3] sm:$0xff] %v1914_v0  ;;  %v1596_v7 = vld [vmem:[#allocation8 + $0x64] sm:$0xf0]  ;;  %v1334_v8 = vor.u32 %v1614_v5, %v1333_v3  ;;  %v1325_v9 = vld [vmem:[#allocation8 + $0xe0] sm:$0xf]  ;;  %v1677_v25 = vunpack.c.l.bf16 %v1676_v23  ;;  %v1678_v26 = vunpack.c.h.bf16 %v1676_v23  ;;  %v159_v38 = vpack.c.bf16 %v1681_v35, %v1681_v35 }
  0x20   :  { %128 = vst [vmem:[#allocation3 + $0x18] sm:$0xff] %v1914_v0  ;;  %v1612_v10 = vld [vmem:[#allocation8 + $0xe4] sm:$0xf0]  ;;  %387 = vmatpush.bf16.msra.mxu0 %v1270_v4  ;;  %v1262_v11 = vor.u32 %v1596_v7, %v1261_v6  ;;  %v1253_v13 = vld [vmem:[#allocation8 + $0x50] sm:$0xf]  ;;  %v160_v42 = vpack.c.bf16 %v1682_v36, %v1682_v36  ;;  %v1634_v27 = vld [vmem:[#allocation11 + $0x78] sm:$0xff] }
  0x21   :  { %406 = vmatpush.bf16.msra.mxu1 %v1334_v8  ;;  %v1326_v12 = vor.u32 %v1612_v10, %v1325_v9  ;;  %v1594_v14 = vld [vmem:[#allocation8 + $0x54] sm:$0xf0]  ;;  %v1317_v15 = vld [vmem:[#allocation8 + $0xd0] sm:$0xf]  ;;  %v1245_v19 = vld [vmem:[#allocation8 + $0x40] sm:$0xf]  ;;  %v157_v33 = vpack.c.bf16 %v1677_v25, %v1677_v25  ;;  %v158_v34 = vpack.c.bf16 %v1678_v26, %v1678_v26 }
  0x22   :  { %v1610_v16 = vld [vmem:[#allocation8 + $0xd4] sm:$0xf0]  ;;  %v1254_v17 = vor.u32 %v1594_v14, %v1253_v13  ;;  %v1592_v20 = vld [vmem:[#allocation8 + $0x44] sm:$0xf0]  ;;  %v1309_v21 = vld [vmem:[#allocation8 + $0xc0] sm:$0xf] }
  0x23   :  { %v1318_v18 = vor.u32 %v1610_v16, %v1317_v15  ;;  %v1608_v22 = vld [vmem:[#allocation8 + $0xc4] sm:$0xf0]  ;;  %v1246_v24 = vor.u32 %v1592_v20, %v1245_v19  ;;  %v1237_v29 = vld [vmem:[#allocation8 + $0x30] sm:$0xf]  ;;  %v1590_v30 = vld [vmem:[#allocation8 + $0x34] sm:$0xf0] }
  0x24   :  { %388 = vmatpush.bf16.msra.mxu0 %v1262_v11  ;;  %v1310_v28 = vor.u32 %v1608_v22, %v1309_v21  ;;  %v1301_v31 = vld [vmem:[#allocation8 + $0xb0] sm:$0xf]  ;;  %v1606_v32 = vld [vmem:[#allocation8 + $0xb4] sm:$0xf0]  ;;  %137 = vst [vmem:[#allocation2 + $0x8] sm:$0xff] %v1677_v25  ;;  %v1238_v37 = vor.u32 %v1590_v30, %v1237_v29 }
  0x25   :  { %407 = vmatpush.bf16.msra.mxu1 %v1326_v12  ;;  %138 = vst [vmem:[#allocation2 + $0x10] sm:$0xff] %v1678_v26  ;;  %v1302_v39 = vor.u32 %v1606_v32, %v1301_v31  ;;  %v1229_v40 = vld [vmem:[#allocation8 + $0x20] sm:$0xf]  ;;  %v1588_v41 = vld [vmem:[#allocation8 + $0x24] sm:$0xf0]  ;;  %v1633_v31 = vld [vmem:[#allocation11 + $0x70] sm:$0xff] }
  0x26   :  { %161 = vst [vmem:[#allocation4 + $0x4] sm:$0xf] %v157_v33  ;;  %v1293_v43 = vld [vmem:[#allocation8 + $0xa0] sm:$0xf]  ;;  %v1604_v44 = vld [vmem:[#allocation8 + $0xa4] sm:$0xf0]  ;;  %v1230_v47 = vor.u32 %v1588_v41, %v1229_v40 }
  0x27   :  { %162 = vst [vmem:[#allocation4 + $0xc] sm:$0xf] %v158_v34  ;;  %v1221_v45 = vld [vmem:[#allocation8 + $0x10] sm:$0xf]  ;;  %v1586_v46 = vld [vmem:[#allocation8 + $0x14] sm:$0xf0]  ;;  %v1294_v52 = vor.u32 %v1604_v44, %v1293_v43 }
  0x28   :  { %389 = vmatpush.bf16.msra.mxu0 %v1254_v17  ;;  %139 = vst [vmem:[#allocation2 + $0x20] sm:$0xff] %v1681_v35  ;;  %v1285_v48 = vld [vmem:[#allocation8 + $0x90] sm:$0xf]  ;;  %v1602_v49 = vld [vmem:[#allocation8 + $0x94] sm:$0xf0]  ;;  %v1222_v0 = vor.u32 %v1586_v46, %v1221_v45 }
  0x29   :  { %408 = vmatpush.bf16.msra.mxu1 %v1318_v18  ;;  %140 = vst [vmem:[#allocation2 + $0x28] sm:$0xff] %v1682_v36  ;;  %v1597_v50 = vld [vmem:[#allocation8 + $0x74] sm:$0xf]  ;;  %v1271_v51 = vld [vmem:[#allocation8 + $0x78] sm:$0xf0]  ;;  %v1286_v4 = vor.u32 %v1602_v49, %v1285_v48 }
  0x2a   :  { %163 = vst [vmem:[#allocation4 + $0x14] sm:$0xf] %v159_v38  ;;  %v1274_v54 = vor.u32 %v1597_v50, %v1271_v51  ;;  %v1613_v55 = vld [vmem:[#allocation8 + $0xf4] sm:$0xf]  ;;  %v1335_v58 = vld [vmem:[#allocation8 + $0xf8] sm:$0xf0] }
  0x2b   :  { %v141_v53 = vld [vmem:[#allocation2 + $0x7] sm:$0xff]  ;;  %164 = vst [vmem:[#allocation4 + $0x1c] sm:$0xf] %v160_v42  ;;  %v1595_v59 = vld [vmem:[#allocation8 + $0x64] sm:$0xf]  ;;  %v1338_v61 = vor.u32 %v1613_v55, %v1335_v58 }
  0x2c   :  { %390 = vmatpush.bf16.msra.mxu0 %v1246_v24  ;;  %v142_v56 = vld [vmem:[#allocation2 + $0xf] sm:$0xff]  ;;  %v145_v57 = vpack.c.bf16 %v141_v53, %v141_v53  ;;  %425 = vmatpush.bf16.msra.mxu2 %v1274_v54  ;;  %v1263_v62 = vld [vmem:[#allocation8 + $0x68] sm:$0xf0]  ;;  %v1584_v5 = vld [vmem:[#allocation8 + $0x4] sm:$0xf0] }
  0x2d   :  { %409 = vmatpush.bf16.msra.mxu1 %v1310_v28  ;;  %v146_v60 = vpack.c.bf16 %v142_v56, %v142_v56  ;;  %v1611_v63 = vld [vmem:[#allocation8 + $0xe4] sm:$0xf]  ;;  %v1213_v1 = vld [vmem:[#allocation8] sm:$0xf]  ;;  %v1266_v2 = vor.u32 %v1595_v59, %v1263_v62  ;;  %v1327_v3 = vld [vmem:[#allocation8 + $0xe8] sm:$0xf0]  ;;  %444 = vmatpush.bf16.msra.mxu3 %v1338_v61 }
  0x2e   :  { %149 = vst [vmem:[#allocation4] sm:$0xf] %v145_v57  ;;  %v1330_v7 = vor.u32 %v1611_v63, %v1327_v3  ;;  %v1277_v8 = vld [vmem:[#allocation8 + $0x80] sm:$0xf]  ;;  %v1600_v9 = vld [vmem:[#allocation8 + $0x84] sm:$0xf0]  ;;  %v1214_v13 = vor.u32 %v1584_v5, %v1213_v1 }
  0x2f   :  { %150 = vst [vmem:[#allocation4 + $0x8] sm:$0xf] %v146_v60  ;;  %v143_v6 = vld [vmem:[#allocation2 + $0x1f] sm:$0xff]  ;;  %v1278_v14 = vor.u32 %v1600_v9, %v1277_v8  ;;  %v1199_v16 = vld [vmem:[#allocation4 + $0x8] sm:$0xf0]  ;;  %v1623_v61 = vld [vmem:[#allocation11 + $0x20] sm:$0xff] }
  0x30   :  { %391 = vmatpush.bf16.msra.mxu0 %v1238_v37  ;;  %v144_v10 = vld [vmem:[#allocation2 + $0x27] sm:$0xff]  ;;  %v147_v11 = vpack.c.bf16 %v143_v6, %v143_v6  ;;  %426 = vmatpush.bf16.msra.mxu2 %v1266_v2  ;;  %v1591_v35 = vld [vmem:[#allocation8 + $0x44] sm:$0xf]  ;;  %v1247_v36 = vld [vmem:[#allocation8 + $0x48] sm:$0xf0] }
  0x31   :  { %410 = vmatpush.bf16.msra.mxu1 %v1302_v39  ;;  %v148_v12 = vpack.c.bf16 %v144_v10, %v144_v10  ;;  %v1579_v15 = vld [vmem:[#allocation4 + $0x4] sm:$0xf]  ;;  %445 = vmatpush.bf16.msra.mxu3 %v1330_v7  ;;  %v1581_v23 = vld [vmem:[#allocation4 + $0x14] sm:$0xf]  ;;  %v1255_v29 = vld [vmem:[#allocation8 + $0x58] sm:$0xf0]  ;;  %v1250_v38 = vor.u32 %v1591_v35, %v1247_v36 }
  0x32   :  { %151 = vst [vmem:[#allocation4 + $0x10] sm:$0xf] %v147_v11  ;;  %v1996_v19 = vor.u32 %v1579_v15, %v1199_v16  ;;  %v1207_v24 = vld [vmem:[#allocation4 + $0x18] sm:$0xf0]  ;;  %v1593_v28 = vld [vmem:[#allocation8 + $0x54] sm:$0xf] }
  0x33   :  { %152 = vst [vmem:[#allocation4 + $0x18] sm:$0xf] %v148_v12  ;;  %v2004_v26 = vor.u32 %v1581_v23, %v1207_v24  ;;  %v1258_v30 = vor.u32 %v1593_v28, %v1255_v29  ;;  %v1609_v32 = vld [vmem:[#allocation8 + $0xd4] sm:$0xf]  ;;  %v1319_v33 = vld [vmem:[#allocation8 + $0xd8] sm:$0xf0] }
  0x34   :  { %392 = vmatpush.bf16.msra.mxu0 %v1230_v47  ;;  %v1322_v34 = vor.u32 %v1609_v32, %v1319_v33  ;;  %v1626_v37 = vld [vmem:[#allocation11 + $0x38] sm:$0xff]  ;;  %v1632_v39 = vld [vmem:[#allocation11 + $0x68] sm:$0xff]  ;;  %v1607_v40 = vld [vmem:[#allocation8 + $0xc4] sm:$0xf] }
  0x35   :  { %411 = vmatpush.bf16.msra.mxu1 %v1294_v52  ;;  %v1197_v17 = vld [vmem:[#allocation4] sm:$0xf]  ;;  %427 = vmatpush.bf16.msra.mxu2 %v1258_v30  ;;  %v1311_v41 = vld [vmem:[#allocation8 + $0xc8] sm:$0xf0]  ;;  %v1589_v43 = vld [vmem:[#allocation8 + $0x34] sm:$0xf] }
  0x36   :  { %v1580_v18 = vld [vmem:[#allocation4 + $0x4] sm:$0xf0]  ;;  %446 = vmatpush.bf16.msra.mxu3 %v1322_v34  ;;  %v1314_v42 = vor.u32 %v1607_v40, %v1311_v41  ;;  %v1239_v44 = vld [vmem:[#allocation8 + $0x38] sm:$0xf0]  ;;  %v1631_v47 = vld [vmem:[#allocation11 + $0x60] sm:$0xff] }
  0x37   :  { %v1998_v20 = vor.u32 %v1580_v18, %v1197_v17  ;;  %v1625_v45 = vld [vmem:[#allocation11 + $0x30] sm:$0xff]  ;;  %v1242_v46 = vor.u32 %v1589_v43, %v1239_v44  ;;  %v1303_v49 = vld [vmem:[#allocation8 + $0xb8] sm:$0xf0]  ;;  %v1587_v51 = vld [vmem:[#allocation8 + $0x24] sm:$0xf] }
  0x38   :  { %393 = vmatpush.bf16.msra.mxu0 %v1222_v0  ;;  %v1605_v48 = vld [vmem:[#allocation8 + $0xb4] sm:$0xf]  ;;  %v1231_v52 = vld [vmem:[#allocation8 + $0x28] sm:$0xf0]  ;;  %v1630_v55 = vld [vmem:[#allocation11 + $0x58] sm:$0xff] }
  0x39   :  { %412 = vmatpush.bf16.msra.mxu1 %v1286_v4  ;;  %v1205_v21 = vld [vmem:[#allocation4 + $0x10] sm:$0xf]  ;;  %428 = vmatpush.bf16.msra.mxu2 %v1250_v38  ;;  %v1306_v50 = vor.u32 %v1605_v48, %v1303_v49  ;;  %v1624_v53 = vld [vmem:[#allocation11 + $0x28] sm:$0xff]  ;;  %v1234_v54 = vor.u32 %v1587_v51, %v1231_v52  ;;  %v1603_v56 = vld [vmem:[#allocation8 + $0xa4] sm:$0xf] }
  0x3a   :  { %v1582_v22 = vld [vmem:[#allocation4 + $0x14] sm:$0xf0]  ;;  %447 = vmatpush.bf16.msra.mxu3 %v1314_v42  ;;  %v1295_v57 = vld [vmem:[#allocation8 + $0xa8] sm:$0xf0]  ;;  %v1585_v59 = vld [vmem:[#allocation8 + $0x14] sm:$0xf] }
  0x3b   :  { %v2002_v25 = vor.u32 %v1582_v22, %v1205_v21  ;;  %v1298_v58 = vor.u32 %v1603_v56, %v1295_v57  ;;  %v1223_v60 = vld [vmem:[#allocation8 + $0x18] sm:$0xf0]  ;;  %v1629_v63 = vld [vmem:[#allocation11 + $0x50] sm:$0xff]  ;;  %v1583_v3 = vld [vmem:[#allocation8 + $0x4] sm:$0xf] }
  0x3c   :  { %394 = vmatpush.bf16.msra.mxu0 %v1214_v13  ;;  %v1226_v62 = vor.u32 %v1585_v59, %v1223_v60  ;;  %v1601_v0 = vld [vmem:[#allocation8 + $0x94] sm:$0xf]  ;;  %v1287_v1 = vld [vmem:[#allocation8 + $0x98] sm:$0xf0]  ;;  %v1215_v4 = vld [vmem:[#allocation8 + $0x8] sm:$0xf0] }
  0x3d   :  { %413 = vmatpush.bf16.msra.mxu1 %v1278_v14  ;;  %429 = vmatpush.bf16.msra.mxu2 %v1242_v46  ;;  %v1290_v2 = vor.u32 %v1601_v0, %v1287_v1  ;;  %v1622_v5 = vld [vmem:[#allocation11 + $0x18] sm:$0xff]  ;;  %v1218_v6 = vor.u32 %v1583_v3, %v1215_v4  ;;  %v1628_v7 = vld [vmem:[#allocation11 + $0x48] sm:$0xff]  ;;  %v1599_v8 = vld [vmem:[#allocation8 + $0x84] sm:$0xf] }
  0x3e   :  { %448 = vmatpush.bf16.msra.mxu3 %v1306_v50  ;;  %v1279_v9 = vld [vmem:[#allocation8 + $0x88] sm:$0xf0]  ;;  %v1621_v11 = vld [vmem:[#allocation11 + $0x10] sm:$0xff]  ;;  %v1627_v12 = vld [vmem:[#allocation11 + $0x40] sm:$0xff] }
  0x3f   :  { %395 = vmatmul.bf16.vlgmr.msra.gmra.mxu0 %v1998_v20  ;;  %v1282_v10 = vor.u32 %v1599_v8, %v1279_v9  ;;  %v2009_v13 = vld [vmem:[#allocation10] sm:$0x3]  ;;  %v1620_v14 = vld [vmem:[#allocation11 + $0x8] sm:$0xff]  ;;  %v1619_v16 = vld [vmem:[#allocation11] sm:$0xff] }
  0x40   :  { %414 = vmatmul.bf16.vlgmr.msra.gmra.mxu1 %v1996_v19  ;;  %651 = vmatpush.bf16.msrb.mxu0 %v1626_v37  ;;  %v203_v15 = vperm.slane %v2009_v13, 0  ;;  %v1652_v0 = vld [vmem:[#allocation13 + $0x68] sm:$0xff]  ;;  %v1645_v1 = vld [vmem:[#allocation13 + $0x30] sm:$0xff]  ;;  %v1650_v4 = vld [vmem:[#allocation13 + $0x58] sm:$0xff] }
  0x41   :  { %670 = vmatpush.bf16.msrb.mxu1 %v1634_v27  ;;  %430 = vmatpush.bf16.msra.mxu2 %v1234_v54  ;;  %v1644_v3 = vld [vmem:[#allocation13 + $0x28] sm:$0xff] }
  0x42   :  { %449 = vmatpush.bf16.msra.mxu3 %v1298_v58  ;;  %v1648_v8 = vld [vmem:[#allocation13 + $0x48] sm:$0xff] }
  0x44   :  { %652 = vmatpush.bf16.msrb.mxu0 %v1625_v45 }
  0x45   :  { %671 = vmatpush.bf16.msrb.mxu1 %v1633_v31  ;;  %431 = vmatpush.bf16.msra.mxu2 %v1226_v62  ;;  %v1653_v62 = vld [vmem:[#allocation13 + $0x70] sm:$0xff] }
  0x46   :  { %450 = vmatpush.bf16.msra.mxu3 %v1290_v2  ;;  %v1651_v2 = vld [vmem:[#allocation13 + $0x60] sm:$0xff] }
  0x48   :  { %653 = vmatpush.bf16.msrb.mxu0 %v1624_v53 }
  0x49   :  { %672 = vmatpush.bf16.msrb.mxu1 %v1632_v39  ;;  %432 = vmatpush.bf16.msra.mxu2 %v1218_v6  ;;  %v1649_v6 = vld [vmem:[#allocation13 + $0x50] sm:$0xff] }
  0x4a   :  { %451 = vmatpush.bf16.msra.mxu3 %v1282_v10  ;;  %v204_v10 = vperm.slane %v2009_v13, 1 }
  0x4c   :  { %654 = vmatpush.bf16.msrb.mxu0 %v1623_v61  ;;  %433 = vmatmul.bf16.vlgmr.msra.gmra.mxu2 %v1998_v20  ;;  %v1654_v61 = vld [vmem:[#allocation13 + $0x78] sm:$0xff] }
  0x4d   :  { %673 = vmatpush.bf16.msrb.mxu1 %v1631_v47  ;;  %452 = vmatmul.bf16.vlgmr.msra.gmra.mxu3 %v1996_v19 }
  0x4e   :  { %904 = vmatpush.bf16.msrb.mxu3 %v1654_v61 }
  0x4f   :  { %400 = vmatmul.bf16.gmra.mxu0 %v2002_v25 }
  0x50   :  { %419 = vmatmul.bf16.gmra.mxu1 %v2004_v26  ;;  %655 = vmatpush.bf16.msrb.mxu0 %v1622_v5  ;;  %v1643_v5 = vld [vmem:[#allocation13 + $0x20] sm:$0xff] }
  0x51   :  { %674 = vmatpush.bf16.msrb.mxu1 %v1630_v55 }
  0x52   :  { %905 = vmatpush.bf16.msrb.mxu3 %v1653_v62 }
  0x54   :  { %656 = vmatpush.bf16.msrb.mxu0 %v1621_v11 }
  0x55   :  { %675 = vmatpush.bf16.msrb.mxu1 %v1629_v63  ;;  %v1646_v63 = vld [vmem:[#allocation13 + $0x38] sm:$0xff] }
  0x56   :  { %885 = vmatpush.bf16.msrb.mxu2 %v1646_v63  ;;  %906 = vmatpush.bf16.msrb.mxu3 %v1652_v0 }
  0x58   :  { %657 = vmatpush.bf16.msrb.mxu0 %v1620_v14  ;;  %v1647_v14 = vld [vmem:[#allocation13 + $0x40] sm:$0xff] }
  0x59   :  { %676 = vmatpush.bf16.msrb.mxu1 %v1628_v7  ;;  %v1642_v7 = vld [vmem:[#allocation13 + $0x18] sm:$0xff] }
  0x5a   :  { %886 = vmatpush.bf16.msrb.mxu2 %v1645_v1  ;;  %907 = vmatpush.bf16.msrb.mxu3 %v1651_v2 }
  0x5c   :  { %658 = vmatpush.bf16.msrb.mxu0 %v1619_v16  ;;  %438 = vmatmul.bf16.gmra.mxu2 %v2002_v25  ;;  %v1723_v16 = vld [vmem:[%s2059_s4] ss:$0 sm:$0xff] }
  0x5d   :  { %677 = vmatpush.bf16.msrb.mxu1 %v1627_v12  ;;  %457 = vmatmul.bf16.gmra.mxu3 %v2004_v26  ;;  %v1641_v12 = vld [vmem:[#allocation13 + $0x10] sm:$0xff] }
  0x5e   :  { %887 = vmatpush.bf16.msrb.mxu2 %v1644_v3  ;;  %908 = vmatpush.bf16.msrb.mxu3 %v1650_v4 }
  0x62   :  { %888 = vmatpush.bf16.msrb.mxu2 %v1643_v5  ;;  %909 = vmatpush.bf16.msrb.mxu3 %v1649_v6 }
  0x66   :  { %889 = vmatpush.bf16.msrb.mxu2 %v1642_v7  ;;  %910 = vmatpush.bf16.msrb.mxu3 %v1648_v8 }
  0x6a   :  { %890 = vmatpush.bf16.msrb.mxu2 %v1641_v12  ;;  %911 = vmatpush.bf16.msrb.mxu3 %v1647_v14 }
  0xbc   :  { %v396_v17 = vpop.f32.mrf.mxu0 }
  0xbd   :  { %v397_v18 = vadd.f32 %v396_v17, %v203_v15  ;;  %v415_v21 = vpop.f32.mrf.mxu1 }
  0xbf   :  { %v416_v22 = vadd.f32 %v415_v21, %v397_v18  ;;  %v1640_v18 = vld [vmem:[#allocation13 + $0x8] sm:$0xff] }
  0xc0   :  { %891 = vmatpush.bf16.msrb.mxu2 %v1640_v18 }
  0xc1   :  { %v463_v23 = vmax.f32 %v416_v22, 0.0 }
  0xc3   :  { %467 = vst [vmem:[#allocation3 + $0x8] sm:$0xff] %v463_v23  ;;  %v487_v24 = vpack.c.bf16 %v463_v23, %v463_v23 }
  0xc4   :  { %v398_v20 = vpop.f32.mrf.mxu0 }
  0xc5   :  { %491 = vst [vmem:[#allocation4 + $0x4] sm:$0xf] %v487_v24  ;;  %v399_v27 = vadd.f32 %v398_v20, %v203_v15  ;;  %v417_v19 = vpop.f32.mrf.mxu1 }
  0xc7   :  { %v418_v28 = vadd.f32 %v417_v19, %v399_v27  ;;  %v1639_v27 = vld [vmem:[#allocation13] sm:$0xff] }
  0xc8   :  { %892 = vmatpush.bf16.msrb.mxu2 %v1639_v27  ;;  %v1665_v27 = vld [vmem:[#allocation14 + $0x30] sm:$0xff] }
  0xc9   :  { %v464_v29 = vmax.f32 %v418_v28, 0.0 }
  0xca   :  { %v471_v30 = vld [vmem:[#allocation3 + $0x7] sm:$0xff] }
  0xcb   :  { %v475_v31 = vpack.c.bf16 %v471_v30, %v471_v30  ;;  %468 = vst [vmem:[#allocation3 + $0x10] sm:$0xff] %v464_v29  ;;  %v488_v32 = vpack.c.bf16 %v464_v29, %v464_v29 }
  0xcc   :  { %v401_v33 = vpop.f32.mrf.mxu0  ;;  %v1615_v41 = vld [vmem:[#allocation4 + $0x4] sm:$0xf] }
  0xcd   :  { %479 = vst [vmem:[#allocation4] sm:$0xf] %v475_v31  ;;  %v402_v34 = vadd.f32 %v401_v33, %v203_v15  ;;  %v420_v35 = vpop.f32.mrf.mxu1 }
  0xce   :  { %492 = vst [vmem:[#allocation4 + $0xc] sm:$0xf] %v488_v32 }
  0xcf   :  { %v421_v36 = vadd.f32 %v420_v35, %v402_v34  ;;  %v434_v9 = vpop.f32.mrf.mxu2 }
  0xd0   :  { %v453_v11 = vpop.f32.mrf.mxu3  ;;  %v435_v17 = vadd.f32 %v434_v9, %v204_v10 }
  0xd1   :  { %v465_v37 = vmax.f32 %v421_v36, 0.0 }
  0xd2   :  { %v472_v38 = vld [vmem:[#allocation3 + $0xf] sm:$0xff]  ;;  %v454_v24 = vadd.f32 %v453_v11, %v435_v17 }
  0xd3   :  { %v476_v25 = vpack.c.bf16 %v472_v38, %v472_v38  ;;  %469 = vst [vmem:[#allocation3 + $0x20] sm:$0xff] %v465_v37  ;;  %v489_v39 = vpack.c.bf16 %v465_v37, %v465_v37 }
  0xd4   :  { %v403_v40 = vpop.f32.mrf.mxu0  ;;  %v1341_v50 = vld [vmem:[#allocation4] sm:$0xf] }
  0xd5   :  { %480 = vst [vmem:[#allocation4 + $0x8] sm:$0xf] %v476_v25  ;;  %v404_v26 = vadd.f32 %v403_v40, %v203_v15  ;;  %v1343_v42 = vld [vmem:[#allocation4 + $0x8] sm:$0xf0]  ;;  %v422_v43 = vpop.f32.mrf.mxu1 }
  0xd6   :  { %493 = vst [vmem:[#allocation4 + $0x14] sm:$0xf] %v489_v39  ;;  %v1346_v44 = vor.u32 %v1615_v41, %v1343_v42 }
  0xd7   :  { %v423_v45 = vadd.f32 %v422_v43, %v404_v26  ;;  %v436_v23 = vpop.f32.mrf.mxu2 }
  0xd8   :  { %678 = vmatmul.bf16.vlgmr.msrb.gmra.mxu1 %v1346_v44  ;;  %v455_v19 = vpop.f32.mrf.mxu3  ;;  %v437_v32 = vadd.f32 %v436_v23, %v204_v10  ;;  %v1673_v23 = vld [vmem:[#allocation14 + $0x70] sm:$0xff] }
  0xd9   :  { %v466_v46 = vmax.f32 %v423_v45, 0.0 }
  0xda   :  { %v473_v47 = vld [vmem:[#allocation3 + $0x1f] sm:$0xff]  ;;  %v456_v37 = vadd.f32 %v455_v19, %v437_v32  ;;  %v1664_v19 = vld [vmem:[#allocation14 + $0x28] sm:$0xff] }
  0xdb   :  { %v477_v48 = vpack.c.bf16 %v473_v47, %v473_v47  ;;  %470 = vst [vmem:[#allocation3 + $0x28] sm:$0xff] %v466_v46  ;;  %v490_v49 = vpack.c.bf16 %v466_v46, %v466_v46  ;;  %v1662_v32 = vld [vmem:[#allocation14 + $0x18] sm:$0xff] }
  0xdc   :  { %v1616_v51 = vld [vmem:[#allocation4 + $0x4] sm:$0xf0] }
  0xdd   :  { %481 = vst [vmem:[#allocation4 + $0x10] sm:$0xf] %v477_v48  ;;  %v1342_v52 = vor.u32 %v1616_v51, %v1341_v50  ;;  %v1617_v55 = vld [vmem:[#allocation4 + $0x14] sm:$0xf] }
  0xde   :  { %494 = vst [vmem:[#allocation4 + $0x1c] sm:$0xf] %v490_v49 }
  0xdf   :  { %659 = vmatmul.bf16.vlgmr.msrb.gmra.mxu0 %v1342_v52  ;;  %v439_v36 = vpop.f32.mrf.mxu2 }
  0xe0   :  { %v440_v39 = vadd.f32 %v439_v36, %v204_v10  ;;  %v458_v40 = vpop.f32.mrf.mxu3  ;;  %v1660_v36 = vld [vmem:[#allocation14 + $0x8] sm:$0xff] }
  0xe2   :  { %v474_v53 = vld [vmem:[#allocation3 + $0x27] sm:$0xff]  ;;  %v459_v46 = vadd.f32 %v458_v40, %v440_v39 }
  0xe3   :  { %v478_v54 = vpack.c.bf16 %v474_v53, %v474_v53 }
  0xe4   :  { %v1349_v58 = vld [vmem:[#allocation4 + $0x10] sm:$0xf] }
  0xe5   :  { %482 = vst [vmem:[#allocation4 + $0x18] sm:$0xf] %v478_v54  ;;  %v1351_v56 = vld [vmem:[#allocation4 + $0x18] sm:$0xf0] }
  0xe6   :  { %v1354_v57 = vor.u32 %v1617_v55, %v1351_v56 }
  0xe7   :  { %v441_v50 = vpop.f32.mrf.mxu2 }
  0xe8   :  { %683 = vmatmul.bf16.gmra.mxu1 %v1354_v57  ;;  %v442_v54 = vadd.f32 %v441_v50, %v204_v10  ;;  %v460_v57 = vpop.f32.mrf.mxu3 }
  0xea   :  { %v461_v0 = vadd.f32 %v460_v57, %v442_v54 }
  0xec   :  { %v1618_v59 = vld [vmem:[#allocation4 + $0x14] sm:$0xf0] }
  0xed   :  { %v1350_v60 = vor.u32 %v1618_v59, %v1349_v58 }
  0xef   :  { %664 = vmatmul.bf16.gmra.mxu0 %v1350_v60 }
 0x155   :  { %v679_v15 = vpop.f32.mrf.mxu1 }
 0x15c   :  { %v660_v21 = vpop.f32.mrf.mxu0 }
 0x15d   :  { %v661_v22 = vadd.f32 %v1723_v16, %v660_v21  ;;  %v681_v28 = vpop.f32.mrf.mxu1 }
 0x15f   :  { %v680_v20 = vadd.f32 %v679_v15, %v661_v22  ;;  %v1674_v22 = vld [vmem:[#allocation14 + $0x78] sm:$0xff] }
 0x160   :  { %1134 = vmatpush.bf16.msra.mxu1 %v1674_v22  ;;  %1703 = vmatpush.bf16.msra.mxu3 %v1674_v22 }
 0x161   :  { %v689_v13 = vmax.f32 %v680_v20, 0.0  ;;  %v1672_v20 = vld [vmem:[#allocation14 + $0x68] sm:$0xff] }
 0x163   :  { %v693_v29 = vadd.f32 %v689_v13, %v454_v24  ;;  %v1666_v24 = vld [vmem:[#allocation14 + $0x38] sm:$0xff]  ;;  %v1671_v13 = vld [vmem:[#allocation14 + $0x60] sm:$0xff] }
 0x164   :  { %v662_v30 = vpop.f32.mrf.mxu0  ;;  %1135 = vmatpush.bf16.msra.mxu1 %v1673_v23  ;;  %1704 = vmatpush.bf16.msra.mxu3 %v1673_v23  ;;  %v1725_v23 = vld [vmem:[%s2063_s8] ss:$0 sm:$0xff]  ;;  %s1915_s8 = smov [#allocation16]  }
 0x165   :  { %v2019_v31 = vmax.f32 %v693_v29, 0.0  ;;  %v663_v33 = vadd.f32 %v1723_v16, %v662_v30  ;;  %v684_v41 = vpop.f32.mrf.mxu1  ;;  %1115 = vmatpush.bf16.msra.mxu0 %v1666_v24  ;;  %1695 = vmatpush.bf16.msra.mxu2 %v1666_v24  ;;  %v1663_v29 = vld [vmem:[#allocation14 + $0x20] sm:$0xff]  ;;  %v1669_v30 = vld [vmem:[#allocation14 + $0x50] sm:$0xff]  ;;  %s1177_s20 = sshll.u32 %s1915_s8, 4  ;;  %s1178_s20 = int_to_ptr.vmem [resolvable:$true] %s1177_s20 }
 0x167   :  { %701 = vst [vmem:[#allocation2 + $0x8] sm:$0xff] %v2019_v31  ;;  %v682_v34 = vadd.f32 %v681_v28, %v663_v33  ;;  %v721_v35 = vpack.c.bf16 %v2019_v31, %v2019_v31  ;;  %v1670_v28 = vld [vmem:[#allocation14 + $0x58] sm:$0xff]  ;;  %v1668_v33 = vld [vmem:[#allocation14 + $0x48] sm:$0xff] }
 0x168   :  { %1136 = vmatpush.bf16.msra.mxu1 %v1672_v20  ;;  %1705 = vmatpush.bf16.msra.mxu3 %v1672_v20 }
 0x169   :  { %v690_v38 = vmax.f32 %v682_v34, 0.0  ;;  %725 = vst [vmem:[#allocation4 + $0x4] sm:$0xf] %v721_v35  ;;  %1116 = vmatpush.bf16.msra.mxu0 %v1665_v27  ;;  %1696 = vmatpush.bf16.msra.mxu2 %v1665_v27  ;;  %v1661_v34 = vld [vmem:[#allocation14 + $0x10] sm:$0xff]  ;;  %v1667_v35 = vld [vmem:[#allocation14 + $0x40] sm:$0xff] }
 0x16b   :  { %v694_v25 = vadd.f32 %v690_v38, %v456_v37  ;;  %v1724_v38 = vld [vmem:[%s2061_s6] ss:$0 sm:$0xff] }
 0x16c   :  { %v665_v26 = vpop.f32.mrf.mxu0  ;;  %1137 = vmatpush.bf16.msra.mxu1 %v1671_v13  ;;  %1706 = vmatpush.bf16.msra.mxu3 %v1671_v13 }
 0x16d   :  { %v2024_v42 = vmax.f32 %v694_v25, 0.0  ;;  %v666_v43 = vadd.f32 %v1723_v16, %v665_v26  ;;  %v686_v58 = vpop.f32.mrf.mxu1  ;;  %1117 = vmatpush.bf16.msra.mxu0 %v1664_v19  ;;  %1697 = vmatpush.bf16.msra.mxu2 %v1664_v19  ;;  %v1659_v25 = vld [vmem:[#allocation14] sm:$0xff] }
 0x16e   :  { %v705_v44 = vld [vmem:[#allocation2 + $0x6] sm:$0xff] }
 0x16f   :  { %702 = vst [vmem:[#allocation2 + $0x10] sm:$0xff] %v2024_v42  ;;  %v722_v45 = vpack.c.bf16 %v2024_v42, %v2024_v42  ;;  %v685_v47 = vadd.f32 %v684_v41, %v666_v43  ;;  %v709_v48 = vpack.c.bf16 %v705_v44, %v705_v44 }
 0x170   :  { %v1635_v62 = vld [vmem:[#allocation4 + $0x4] sm:$0xf]  ;;  %1138 = vmatpush.bf16.msra.mxu1 %v1670_v28  ;;  %1707 = vmatpush.bf16.msra.mxu3 %v1670_v28 }
 0x171   :  { %726 = vst [vmem:[#allocation4 + $0xc] sm:$0xf] %v722_v45  ;;  %v691_v49 = vmax.f32 %v685_v47, 0.0  ;;  %1118 = vmatpush.bf16.msra.mxu0 %v1663_v29  ;;  %1698 = vmatpush.bf16.msra.mxu2 %v1663_v29 }
 0x172   :  { %713 = vst [vmem:[#allocation4] sm:$0xf] %v709_v48 }
 0x173   :  { %v695_v51 = vadd.f32 %v691_v49, %v459_v46 }
 0x174   :  { %v667_v52 = vpop.f32.mrf.mxu0  ;;  %1139 = vmatpush.bf16.msra.mxu1 %v1669_v30  ;;  %1708 = vmatpush.bf16.msra.mxu3 %v1669_v30 }
 0x175   :  { %v2029_v53 = vmax.f32 %v695_v51, 0.0  ;;  %v668_v55 = vadd.f32 %v1723_v16, %v667_v52  ;;  %1119 = vmatpush.bf16.msra.mxu0 %v1662_v32  ;;  %1699 = vmatpush.bf16.msra.mxu2 %v1662_v32 }
 0x176   :  { %v706_v56 = vld [vmem:[#allocation2 + $0xe] sm:$0xff] }
 0x177   :  { %v710_v59 = vpack.c.bf16 %v706_v56, %v706_v56  ;;  %703 = vst [vmem:[#allocation2 + $0x20] sm:$0xff] %v2029_v53  ;;  %v687_v60 = vadd.f32 %v686_v58, %v668_v55  ;;  %v723_v61 = vpack.c.bf16 %v2029_v53, %v2029_v53 }
 0x178   :  { %v1423_v63 = vld [vmem:[#allocation4 + $0x8] sm:$0xf0]  ;;  %1140 = vmatpush.bf16.msra.mxu1 %v1668_v33  ;;  %1709 = vmatpush.bf16.msra.mxu3 %v1668_v33 }
 0x179   :  { %714 = vst [vmem:[#allocation4 + $0x8] sm:$0xf] %v710_v59  ;;  %v692_v1 = vmax.f32 %v687_v60, 0.0  ;;  %v1426_v2 = vor.u32 %v1635_v62, %v1423_v63  ;;  %v1421_v8 = vld [vmem:[#allocation4] sm:$0xf]  ;;  %1120 = vmatpush.bf16.msra.mxu0 %v1661_v34  ;;  %1700 = vmatpush.bf16.msra.mxu2 %v1661_v34 }
 0x17a   :  { %727 = vst [vmem:[#allocation4 + $0x14] sm:$0xf] %v723_v61 }
 0x17b   :  { %v696_v3 = vadd.f32 %v692_v1, %v461_v0  ;;  %912 = vmatmul.bf16.vlgmr.msrb.gmra.mxu3 %v1426_v2 }
 0x17c   :  { %1141 = vmatpush.bf16.msra.mxu1 %v1667_v35  ;;  %1710 = vmatpush.bf16.msra.mxu3 %v1667_v35 }
 0x17d   :  { %v2034_v4 = vmax.f32 %v696_v3, 0.0  ;;  %1121 = vmatpush.bf16.msra.mxu0 %v1660_v36  ;;  %1701 = vmatpush.bf16.msra.mxu2 %v1660_v36 }
 0x17e   :  { %v707_v5 = vld [vmem:[#allocation2 + $0x1e] sm:$0xff] }
 0x17f   :  { %704 = vst [vmem:[#allocation2 + $0x28] sm:$0xff] %v2034_v4  ;;  %v711_v6 = vpack.c.bf16 %v707_v5, %v707_v5  ;;  %v724_v7 = vpack.c.bf16 %v2034_v4, %v2034_v4 }
 0x180   :  { %v1636_v9 = vld [vmem:[#allocation4 + $0x4] sm:$0xf0] }
 0x181   :  { %v1422_v10 = vor.u32 %v1636_v9, %v1421_v8  ;;  %715 = vst [vmem:[#allocation4 + $0x10] sm:$0xf] %v711_v6  ;;  %v1637_v14 = vld [vmem:[#allocation4 + $0x14] sm:$0xf]  ;;  %1122 = vmatpush.bf16.msra.mxu0 %v1659_v25  ;;  %1702 = vmatpush.bf16.msra.mxu2 %v1659_v25 }
 0x182   :  { %728 = vst [vmem:[#allocation4 + $0x1c] sm:$0xf] %v724_v7 }
 0x183   :  { %893 = vmatmul.bf16.vlgmr.msrb.gmra.mxu2 %v1422_v10 }
 0x186   :  { %v708_v11 = vld [vmem:[#allocation2 + $0x26] sm:$0xff] }
 0x187   :  { %v712_v12 = vpack.c.bf16 %v708_v11, %v708_v11 }
 0x188   :  { %v1429_v17 = vld [vmem:[#allocation4 + $0x10] sm:$0xf] }
 0x189   :  { %716 = vst [vmem:[#allocation4 + $0x18] sm:$0xf] %v712_v12  ;;  %v1431_v15 = vld [vmem:[#allocation4 + $0x18] sm:$0xf0] }
 0x18a   :  { %v1434_v16 = vor.u32 %v1637_v14, %v1431_v15 }
 0x18c   :  { %917 = vmatmul.bf16.gmra.mxu3 %v1434_v16 }
 0x190   :  { %v1638_v18 = vld [vmem:[#allocation4 + $0x14] sm:$0xf0] }
 0x191   :  { %v1430_v21 = vor.u32 %v1638_v18, %v1429_v17 }
 0x193   :  { %898 = vmatmul.bf16.gmra.mxu2 %v1430_v21 }
 0x1fe   :  { %v913_v37 = vpop.f32.mrf.mxu3 }
 0x206   :  { %v894_v39 = vpop.f32.mrf.mxu2  ;;  %v915_v43 = vpop.f32.mrf.mxu3 }
 0x207   :  { %v895_v40 = vadd.f32 %v1724_v38, %v894_v39 }
 0x209   :  { %v914_v26 = vadd.f32 %v913_v37, %v895_v40 }
 0x20b   :  { %v923_v41 = vmax.f32 %v914_v26, 0.0 }
 0x20d   :  { %931 = vst [vmem:[#allocation3 + $0x8] sm:$0xff] %v923_v41  ;;  %v951_v44 = vpack.c.bf16 %v923_v41, %v923_v41 }
 0x20e   :  { %v896_v45 = vpop.f32.mrf.mxu2 }
 0x20f   :  { %955 = vst [vmem:[#allocation4 + $0x4] sm:$0xf] %v951_v44  ;;  %v897_v46 = vadd.f32 %v1724_v38, %v896_v45  ;;  %v918_v54 = vpop.f32.mrf.mxu3 }
 0x211   :  { %v916_v47 = vadd.f32 %v915_v43, %v897_v46 }
 0x213   :  { %v924_v48 = vmax.f32 %v916_v47, 0.0 }
 0x214   :  { %v935_v49 = vld [vmem:[#allocation3 + $0x6] sm:$0xff] }
 0x215   :  { %v939_v50 = vpack.c.bf16 %v935_v49, %v935_v49  ;;  %932 = vst [vmem:[#allocation3 + $0x10] sm:$0xff] %v924_v48  ;;  %v952_v51 = vpack.c.bf16 %v924_v48, %v924_v48 }
 0x216   :  { %v899_v52 = vpop.f32.mrf.mxu2  ;;  %v1655_v63 = vld [vmem:[#allocation4 + $0x4] sm:$0xf] }
 0x217   :  { %943 = vst [vmem:[#allocation4] sm:$0xf] %v939_v50  ;;  %v900_v55 = vadd.f32 %v1724_v38, %v899_v52  ;;  %v920_v1 = vpop.f32.mrf.mxu3 }
 0x218   :  { %956 = vst [vmem:[#allocation4 + $0xc] sm:$0xf] %v952_v51 }
 0x219   :  { %v919_v56 = vadd.f32 %v918_v54, %v900_v55 }
 0x21b   :  { %v925_v57 = vmax.f32 %v919_v56, 0.0 }
 0x21c   :  { %v936_v58 = vld [vmem:[#allocation3 + $0xe] sm:$0xff] }
 0x21d   :  { %v940_v59 = vpack.c.bf16 %v936_v58, %v936_v58  ;;  %933 = vst [vmem:[#allocation3 + $0x20] sm:$0xff] %v925_v57  ;;  %v953_v60 = vpack.c.bf16 %v925_v57, %v925_v57 }
 0x21e   :  { %v901_v61 = vpop.f32.mrf.mxu2  ;;  %v1501_v9 = vld [vmem:[#allocation4] sm:$0xf] }
 0x21f   :  { %944 = vst [vmem:[#allocation4 + $0x8] sm:$0xf] %v940_v59  ;;  %v902_v62 = vadd.f32 %v1724_v38, %v901_v61  ;;  %v1503_v0 = vld [vmem:[#allocation4 + $0x8] sm:$0xf0] }
 0x220   :  { %957 = vst [vmem:[#allocation4 + $0x14] sm:$0xf] %v953_v60  ;;  %v1506_v2 = vor.u32 %v1655_v63, %v1503_v0 }
 0x221   :  { %v921_v3 = vadd.f32 %v920_v1, %v902_v62 }
 0x222   :  { %1142 = vmatmul.bf16.vlgmr.msra.gmra.mxu1 %v1506_v2 }
 0x223   :  { %v926_v5 = vmax.f32 %v921_v3, 0.0 }
 0x224   :  { %v937_v6 = vld [vmem:[#allocation3 + $0x1e] sm:$0xff] }
 0x225   :  { %v941_v7 = vpack.c.bf16 %v937_v6, %v937_v6  ;;  %934 = vst [vmem:[#allocation3 + $0x28] sm:$0xff] %v926_v5  ;;  %v954_v8 = vpack.c.bf16 %v926_v5, %v926_v5 }
 0x226   :  { %v1656_v10 = vld [vmem:[#allocation4 + $0x4] sm:$0xf0] }
 0x227   :  { %945 = vst [vmem:[#allocation4 + $0x10] sm:$0xf] %v941_v7  ;;  %v1502_v11 = vor.u32 %v1656_v10, %v1501_v9  ;;  %v1657_v15 = vld [vmem:[#allocation4 + $0x14] sm:$0xf] }
 0x228   :  { %958 = vst [vmem:[#allocation4 + $0x1c] sm:$0xf] %v954_v8 }
 0x229   :  { %1123 = vmatmul.bf16.vlgmr.msra.gmra.mxu0 %v1502_v11 }
 0x22c   :  { %v938_v12 = vld [vmem:[#allocation3 + $0x26] sm:$0xff] }
 0x22d   :  { %v942_v14 = vpack.c.bf16 %v938_v12, %v938_v12 }
 0x22e   :  { %v1509_v18 = vld [vmem:[#allocation4 + $0x10] sm:$0xf] }
 0x22f   :  { %946 = vst [vmem:[#allocation4 + $0x18] sm:$0xf] %v942_v14  ;;  %v1511_v16 = vld [vmem:[#allocation4 + $0x18] sm:$0xf0] }
 0x230   :  { %v1514_v17 = vor.u32 %v1657_v15, %v1511_v16 }
 0x232   :  { %1147 = vmatmul.bf16.vlgmr.msra.gmra.mxu3 %v1514_v17 }
 0x236   :  { %v1658_v21 = vld [vmem:[#allocation4 + $0x14] sm:$0xf0] }
 0x237   :  { %v1510_v22 = vor.u32 %v1658_v21, %v1509_v18 }
 0x239   :  { %1128 = vmatmul.bf16.vlgmr.msra.gmra.mxu2 %v1510_v22 }
 0x29f   :  { %v1143_v20 = vpop.f32.mrf.mxu1 }
 0x2a6   :  { %v1124_v24 = vpop.f32.mrf.mxu0 }
 0x2a7   :  { %v1125_v27 = vadd.f32 %v1725_v23, %v1124_v24  ;;  %v1145_v30 = vpop.f32.mrf.mxu1 }
 0x2a9   :  { %v1144_v13 = vadd.f32 %v1143_v20, %v1125_v27 }
 0x2ab   :  { %v1153_v28 = vmax.f32 %v1144_v13, 0.0 }
 0x2ad   :  { %v1157_v33 = vadd.f32 %v1153_v28, %v2019_v31 }
 0x2ae   :  { %v1126_v19 = vpop.f32.mrf.mxu0 }
 0x2af   :  { %v1127_v29 = vadd.f32 %v1725_v23, %v1126_v19  ;;  %v1161_v36 = vmax.f32 %v1157_v33, 0.0 }
 0x2b1   :  { %v1146_v32 = vadd.f32 %v1145_v30, %v1127_v29 }
 0x2b3   :  { %v1154_v34 = vmax.f32 %v1146_v32, 0.0 }
 0x2b5   :  { %v1158_v35 = vadd.f32 %v1154_v34, %v2024_v42  ;;  %v1148_v39 = vpop.f32.mrf.mxu3 }
 0x2b7   :  { %v1162_v37 = vmax.f32 %v1158_v35, 0.0 }
 0x2b9   :  { %v1686_v38 = vpack.c.bf16 %v1162_v37, %v1161_v36 }
 0x2bb   :  { %1687 = vst [vmem:[#allocation16] sm:$0xff] %v1686_v38  }
 0x2bc   :  { %v1129_v25 = vpop.f32.mrf.mxu2 }
 0x2bd   :  { %v1130_v40 = vadd.f32 %v1725_v23, %v1129_v25  ;;  %v1150_v45 = vpop.f32.mrf.mxu3 }
 0x2bf   :  { %v1149_v26 = vadd.f32 %v1148_v39, %v1130_v40 }
 0x2c1   :  { %v1155_v43 = vmax.f32 %v1149_v26, 0.0 }
 0x2c3   :  { %v1159_v47 = vadd.f32 %v1155_v43, %v2029_v53 }
 0x2c4   :  { %v1131_v41 = vpop.f32.mrf.mxu2 }
 0x2c5   :  { %v1132_v44 = vadd.f32 %v1725_v23, %v1131_v41  ;;  %v1163_v42 = vmax.f32 %v1159_v47, 0.0 }
 0x2c7   :  { %v1151_v46 = vadd.f32 %v1150_v45, %v1132_v44 }
 0x2c9   :  { %v1156_v48 = vmax.f32 %v1151_v46, 0.0 }
 0x2cb   :  { %v1160_v31 = vadd.f32 %v1156_v48, %v2034_v4 }
 0x2cd   :  { %v1164_v49 = vmax.f32 %v1160_v31, 0.0 }
 0x2cf   :  { %v1691_v50 = vpack.c.bf16 %v1164_v49, %v1163_v42 }
 0x2d1   :  { %1694 = vst [vmem:[#allocation16 + $0x8] sm:$0xff] %v1691_v50  }
 0x2d2   :  { %1185 = dma.vmem_to_hbm [thread:$0]  %s1178_s20, 256, %s1180_s23, [#allocation7], %s1908_s1, %s1908_s1, %s1909_s24  }
 0x2d3   :  { %1902 = dma.done.wait [#allocation7], 256  }
 0x2d4   :  { %1903 = vsyncadd [#allocation7], 4294967040 }
 0x2d5   :  { %1190 = vsyncpa [#allocation6], 1 }
 0x2d6   :  { %1191 = vsyncpa [#allocation9], 1 }
 0x2d7   :  { %1192 = vsyncpa [#allocation12], 1 }
 0x2d8   :  { %1193 = vsyncpa [#allocation15], 1 }
 0x2d9   :  { %1194 = vsyncpa [#allocation7], 1 }

</bundles_post_ra>
